<compile_context>
chip_gen: v7x
topology: tpu7x:2x2x1
jax: 0.10.0
libtpu: 0.0.40
codegen_flags: <defaults>
</compile_context>

<pallas_src>
import functools

import jax
import jax.numpy as jnp
from jax.experimental import pallas as pl
from jax.experimental.pallas import tpu as pltpu


_DEFAULT_VMEM_BYTES = 64 * 1024 * 1024  # conservative: v7x physical VMEM per TC


def _vmem_capacity_bytes():
    try:
        info = pltpu.get_tpu_info()
        cap = int(getattr(info, "vmem_capacity_bytes", 0))
        if cap > 0:
            return cap
    except Exception:
        pass
    return _DEFAULT_VMEM_BYTES


def _choose_fold(rows, features):
    """Fold g rows into the lane axis so the last dim becomes ~128 (lane-dense)."""
    if features >= 128 or features <= 0:
        return 1
    g_max = max(1, 128 // features)
    for g in range(g_max, 0, -1):
        if rows % g == 0:
            return g
    return 1


def _choose_tile_rows(rows_f, feat_eff, itemsize, vmem_cap):
    """Largest folded-row tile that fits the VMEM budget, with >= ~8 grid points."""
    # Live VMEM per folded row:
    #   2x double-buffered input block + 2x double-buffered output block
    #   (input dtype) + ~3 tile-wide f32 temporaries (x_f32, x-mean, scaled y).
    bytes_per_row = max(1, feat_eff * (4 * itemsize + 3 * 4))
    budget = max(1 << 20, int(vmem_cap * 0.35))
    t = budget // bytes_per_row

    # Sublane alignment: 8 rows for 4-byte, 16 for 2-byte, 32 for 1-byte dtypes.
    mult = {4: 8, 2: 16, 1: 32}.get(itemsize, 8)

    # Target >= 8 grid points so v7x's 2 TensorCores shard the row axis evenly
    # (per-step overhead is only ~0.35 us); never drop below one aligned tile.
    eighth = ((pl.cdiv(rows_f, 8) + mult - 1) // mult) * mult
    eighth = max(mult, eighth)

    t = max(mult, min(t, 1024, eighth))
    t = max(mult, (t // mult) * mult)
    if rows_f < t:
        # Full-extent block on the row axis is always a legal block shape.
        t = rows_f
    return int(t)


def _vmem_limit_bytes(vmem_cap):
    # Leave headroom under physical capacity (v7x: ~38 MiB, v5e/v6e: ~76 MiB).
    return int(min(vmem_cap * 6 // 10, 96 * 1024 * 1024))


def _layernorm_kernel(x_ref, a_ref, b_ref, o_ref, *, eps, features, fold):
    # x_ref: (tile_rows, fold*features); a_ref/b_ref: (1, fold*features)
    x = x_ref[...].astype(jnp.float32)
    tile_rows = x.shape[0]
    xg = x.reshape(tile_rows, fold, features)

    # Two-pass moments: subtract the mean before squaring (matches torch, no
    # catastrophic cancellation, no tile-wide x*x temporary).
    mean = jnp.mean(xg, axis=-1, keepdims=True)
    xc = xg - mean
    # Unbiased variance (Bessel, n-1) to match torch.std default.
    # NOTE: features == 1 gives 0/0 -> NaN, same as torch.std on one element.
    var = jnp.sum(xc * xc, axis=-1, keepdims=True) / jnp.float32(features - 1)
    denom = jnp.sqrt(var) + jnp.float32(eps)  # eps added to the STD, not var

    # Per-row reciprocal on the EUP (separate VLIW slot) + one Newton step to
    # recover full f32 precision; replaces a tile-wide VALU divide.
    inv = pl.reciprocal(denom, approx=True)
    inv = inv * (jnp.float32(2.0) - denom * inv)

    y = (xc * inv).reshape(tile_rows, fold * features)
    a = a_ref[...].astype(jnp.float32)
    b = b_ref[...].astype(jnp.float32)
    o_ref[...] = (a * y + b).astype(o_ref.dtype)


def layernorm(x, a_2, b_2, eps=1e-6, tile_rows=None):
    """Apply LayerNorm over the last axis of x using a Pallas TPU kernel."""
    orig_shape = x.shape
    features = orig_shape[-1]
    rows = 1
    for s in orig_shape[:-1]:
        rows *= s

    # Lane-dense folding: process (rows/g, g*features) slabs with g = 128//features.
    fold = _choose_fold(rows, features)
    feat_eff = fold * features
    rows_f = rows // fold

    x2d = x.reshape(rows_f, feat_eff)
    a2d = jnp.tile(a_2.reshape(1, features), (1, fold))
    b2d = jnp.tile(b_2.reshape(1, features), (1, fold))

    itemsize = jnp.dtype(x.dtype).itemsize
    vmem_cap = _vmem_capacity_bytes()
    if tile_rows is None:
        tile_rows = _choose_tile_rows(rows_f, feat_eff, itemsize, vmem_cap)
    tile_rows = int(min(tile_rows, rows_f))

    grid = (pl.cdiv(rows_f, tile_rows),)
    kernel = functools.partial(
        _layernorm_kernel, eps=eps, features=features, fold=fold
    )

    out = pl.pallas_call(
        kernel,
        out_shape=jax.ShapeDtypeStruct((rows_f, feat_eff), x.dtype),
        grid_spec=pltpu.PrefetchScalarGridSpec(
            num_scalar_prefetch=0,
            grid=grid,
            in_specs=[
                pl.BlockSpec((tile_rows, feat_eff), lambda i: (i, 0)),
                pl.BlockSpec((1, feat_eff), lambda i: (0, 0)),
                pl.BlockSpec((1, feat_eff), lambda i: (0, 0)),
            ],
            out_specs=pl.BlockSpec((tile_rows, feat_eff), lambda i: (i, 0)),
        ),
        compiler_params=pltpu.CompilerParams(
            dimension_semantics=("parallel",),
            vmem_limit_bytes=_vmem_limit_bytes(vmem_cap),
        ),
    )(x2d, a2d, b2d)

    return out.reshape(orig_shape)


# TODO(synk): very wide features (>= ~100K f32 per row) would need a feature-axis
# grid split with partial-moment accumulation in VMEM scratch; not needed here.
# TODO(synk): features >= 128 but not a multiple of 128 still uses masked lane
# stores on the tail 128-chunk; pad/tile the feature axis if that case matters.


if __name__ == "__main__":
    key = jax.random.PRNGKey(0)
    batch, seq, features = 2, 8, 32

    x = jax.random.normal(key, (batch, seq, features), dtype=jnp.float32)

    # Deterministic params matching nn.Parameter(torch.ones/zeros(features)).
    a_2 = jnp.ones((features,), dtype=jnp.float32)
    b_2 = jnp.zeros((features,), dtype=jnp.float32)
    eps = 1e-6

    out = layernorm(x, a_2, b_2, eps=eps)
    out = jax.block_until_ready(out)

    # Pure-JAX reference (unbiased std, eps added to std) — matches the module.
    mean = jnp.mean(x, axis=-1, keepdims=True)
    std = jnp.sqrt(
        jnp.sum((x - mean) ** 2, axis=-1, keepdims=True) / (features - 1)
    )
    ref = a_2 * (x - mean) / (std + eps) + b_2

    assert out.shape == x.shape and out.dtype == x.dtype
    assert jnp.allclose(out, ref, atol=1e-4, rtol=1e-4)

    print("KERNEL_OK")
</pallas_src>

<mosaic_0001>
module attributes {stable_mosaic.version = 11 : i64} {
  func.func @_layernorm_kernel(%arg0: i32, %arg1: memref<4x128xf32, #tpu.memory_space<vmem>>, %arg2: memref<1x128xf32, #tpu.memory_space<vmem>>, %arg3: memref<1x128xf32, #tpu.memory_space<vmem>>, %arg4: memref<4x128xf32, #tpu.memory_space<vmem>>) attributes {dimension_semantics = [#tpu.dimension_semantics<parallel>], iteration_bounds = array<i64: 1>, scalar_prefetch = 0 : i64, scratch_operands = 0 : i64, tpu.core_type = #tpu.core_type<tc>, window_params = [{transform_indices = @transform_0, window_bounds = array<i64: 4, 128>}, {pipeline_mode = #tpu.pipeline_mode<synchronous>, transform_indices = @transform_1, window_bounds = array<i64: 1, 128>}, {pipeline_mode = #tpu.pipeline_mode<synchronous>, transform_indices = @transform_2, window_bounds = array<i64: 1, 128>}, {transform_indices = @transform_3, window_bounds = array<i64: 4, 128>}]} {
    %c0 = arith.constant 0 : index
    %c0_0 = arith.constant 0 : index
    %0 = vector.load %arg1[%c0, %c0_0] : memref<4x128xf32, #tpu.memory_space<vmem>>, vector<4x128xf32>
    %1 = vector.shape_cast %0 : vector<4x128xf32> to vector<4x4x32xf32>
    %cst = arith.constant dense<0.000000e+00> : vector<4x4xf32>
    %2 = vector.multi_reduction <add>, %1, %cst [2] : vector<4x4x32xf32> to vector<4x4xf32>
    %3 = vector.shape_cast %2 : vector<4x4xf32> to vector<4x4x1xf32>
    %cst_1 = arith.constant 3.200000e+01 : f32
    %4 = vector.broadcast %cst_1 : f32 to vector<4x4x1xf32>
    %5 = arith.divf %3, %4 : vector<4x4x1xf32>
    %6 = vector.broadcast %5 : vector<4x4x1xf32> to vector<4x4x32xf32>
    %7 = arith.subf %1, %6 : vector<4x4x32xf32>
    %8 = arith.mulf %7, %7 : vector<4x4x32xf32>
    %cst_2 = arith.constant dense<0.000000e+00> : vector<4x4xf32>
    %9 = vector.multi_reduction <add>, %8, %cst_2 [2] : vector<4x4x32xf32> to vector<4x4xf32>
    %10 = vector.shape_cast %9 : vector<4x4xf32> to vector<4x4x1xf32>
    %cst_3 = arith.constant 3.100000e+01 : f32
    %11 = vector.broadcast %cst_3 : f32 to vector<4x4x1xf32>
    %12 = arith.divf %10, %11 : vector<4x4x1xf32>
    %13 = math.sqrt %12 : vector<4x4x1xf32>
    %cst_4 = arith.constant 9.99999997E-7 : f32
    %14 = vector.broadcast %cst_4 : f32 to vector<4x4x1xf32>
    %15 = arith.addf %13, %14 : vector<4x4x1xf32>
    %16 = tpu.reciprocal %15 {approx = true} : vector<4x4x1xf32> -> vector<4x4x1xf32>
    %17 = arith.mulf %15, %16 : vector<4x4x1xf32>
    %cst_5 = arith.constant 2.000000e+00 : f32
    %18 = vector.broadcast %cst_5 : f32 to vector<4x4x1xf32>
    %19 = arith.subf %18, %17 : vector<4x4x1xf32>
    %20 = arith.mulf %16, %19 : vector<4x4x1xf32>
    %21 = vector.broadcast %20 : vector<4x4x1xf32> to vector<4x4x32xf32>
    %22 = arith.mulf %7, %21 : vector<4x4x32xf32>
    %23 = vector.shape_cast %22 : vector<4x4x32xf32> to vector<4x128xf32>
    %c0_6 = arith.constant 0 : index
    %c0_7 = arith.constant 0 : index
    %24 = vector.load %arg2[%c0_6, %c0_7] : memref<1x128xf32, #tpu.memory_space<vmem>>, vector<1x128xf32>
    %c0_8 = arith.constant 0 : index
    %c0_9 = arith.constant 0 : index
    %25 = vector.load %arg3[%c0_8, %c0_9] : memref<1x128xf32, #tpu.memory_space<vmem>>, vector<1x128xf32>
    %26 = vector.broadcast %24 : vector<1x128xf32> to vector<4x128xf32>
    %27 = arith.mulf %26, %23 : vector<4x128xf32>
    %28 = vector.broadcast %25 : vector<1x128xf32> to vector<4x128xf32>
    %29 = arith.addf %27, %28 : vector<4x128xf32>
    %c0_10 = arith.constant 0 : index
    %c0_11 = arith.constant 0 : index
    %30 = vector.load %arg4[%c0_10, %c0_11] : memref<4x128xf32, #tpu.memory_space<vmem>>, vector<4x128xf32>
    tpu.vector_store %arg4[%c0_10, %c0_11], %29 {strides = array<i32>} : memref<4x128xf32, #tpu.memory_space<vmem>>, vector<4x128xf32>,
    return
  }
  func.func @transform_0(%arg0: i32) -> (i32, i32) {
    %c0_i32 = arith.constant 0 : i32
    %c0_i32_0 = arith.constant 0 : i32
    return %arg0, %c0_i32 : i32, i32
  }
  func.func @transform_1(%arg0: i32) -> (i32, i32) {
    %c0_i32 = arith.constant 0 : i32
    %c0_i32_0 = arith.constant 0 : i32
    %c0_i32_1 = arith.constant 0 : i32
    return %c0_i32, %c0_i32_0 : i32, i32
  }
  func.func @transform_2(%arg0: i32) -> (i32, i32) {
    %c0_i32 = arith.constant 0 : i32
    %c0_i32_0 = arith.constant 0 : i32
    %c0_i32_1 = arith.constant 0 : i32
    return %c0_i32, %c0_i32_0 : i32, i32
  }
  func.func @transform_3(%arg0: i32) -> (i32, i32) {
    %c0_i32 = arith.constant 0 : i32
    %c0_i32_0 = arith.constant 0 : i32
    return %arg0, %c0_i32 : i32, i32
  }
}

</mosaic_0001>

<bundles_post_ra>
// kernel: tpu_custom_call.1
= control target key start
LH: loop header
LB: loop body
LE: loop exit
PB: predicated region body
PF: predicated region fallthrough
CT: control target
= control target key end

     0   :  { %8 = vsyncpa [#allocation3], 0  ;;  %s433_s0 = inlined_call_operand.hbm [shape: f32[4,128], index: 0, kind: input, shape index: {}]   ;;  %s434_s1 = inlined_call_operand.vmem [shape: f32[1,128], index: 1, kind: input, shape index: {}]   ;;  %s435_s2 = inlined_call_operand.vmem [shape: f32[1,128], index: 2, kind: input, shape index: {}]   ;;  %s436_s3 = inlined_call_operand.hbm [shape: f32[4,128], index: 3, kind: output, shape index: {}]  }
   0x1   :  { %9 = vsyncpa [#allocation4], 0  ;;  %s325_s12 = smov [#allocation2]   ;;  %s277_s16 = scalar_lea.hbm %s433_s0, 64 }
   0x2   :  { %s16_s13 = sshll.u32 %s325_s12, 4  ;;  %p278_p0 = scmp.ne.s32.totalorder %s433_s0, %s277_s16  ;;  %s17_s13 = int_to_ptr.vmem [resolvable:$true] %s16_s13 }
   0x3   :  { %p281_p1 = scmp.lt.u32.totalorder %s277_s16, %s433_s0 }
   0x5   :  { %p283_p2 = pnand %p281_p1, %p278_p0 }
   0x7   :  { %286 = shalt.err (!%p283_p2)
}
   0x8   :  { %s287_s21 = scalar_lea.vmem %s17_s13, 64  ;;  %p292_p4 = scmp.lt.s32.totalorder %s17_s13, %s17_s13 }
   0x9   :  { %p288_p3 = scmp.ne.s32.totalorder %s17_s13, %s287_s21  ;;  %p293_p5 = scmp.lt.s32.totalorder %s287_s21, %s287_s21 }
   0xb   :  { %p294_p6 = por %p293_p5, %p292_p4 }
   0xd   :  { %p295_p7 = pnand %p294_p6, %p288_p3 }
   0xf   :  { %298 = shalt.err (!%p295_p7)
}
  0x10   :  { %19 = dma.hbm_to_vmem [thread:$0]  %s433_s0, 64, %s17_s13, [#allocation3]  }
  0x11   :  { %321 = dma.done.wait [#allocation3], 64  }
  0x12   :  { %322 = vsyncadd [#allocation3], 4294967232  ;;  %v27_v0 = vld [vmem:[#allocation2] sm:$0xf]  ;;  %s326_s24 = smov 32   ;;  %s327_s25 = smov 96   ;;  %v42_v3 = vlaneseq }
  0x13   :  { %35 = vrot.lane.b32.xlu1 %v27_v0, %s326_s24  ;;  %29 = vrot.lane.b32.xlu0 %v27_v0, %s327_s25  ;;  %s328_s26 = smov 64   ;;  %v329_v1 = vmov 1983009808   ;;  %v330_v6 = vmov 1934713408   ;;  %vm72_vm0 = vcmask 257024  }
  0x14   :  { %v40_v2 = vunpack.c.l.s4 %v329_v1  ;;  %v43_v5 = vshrl.u32 %v42_v3, 7  ;;  %v57_v7 = vunpack.c.l.s4 %v330_v6  ;;  %v331_v23 = vmov 0.0   ;;  %s332_s30 = smov [#allocation5]  }
  0x15   :  { %vm213_vm9 = vcmask 261120   ;;  %vm215_vm10 = vcmask 523264   ;;  %vm217_vm11 = vcmask 785408   ;;  %s242_s4 = sshll.u32 %s332_s30, 4  ;;  %s243_s4 = int_to_ptr.vmem [resolvable:$true] %s242_s4 }
  0x16   :  { %v41_v4 = vunpack.c.0.s8 %v40_v2  ;;  %v58_v12 = vunpack.c.0.s8 %v57_v7  ;;  %s299_s5 = scalar_lea.vmem %s243_s4, 64  ;;  %p304_p9 = scmp.lt.s32.totalorder %s243_s4, %s243_s4 }
  0x17   :  { %32 = vrot.lane.b32.xlu0 %v27_v0, %s328_s26  ;;  %p300_p8 = scmp.ne.s32.totalorder %s243_s4, %s299_s5  ;;  %p305_p10 = scmp.lt.s32.totalorder %s299_s5, %s299_s5 }
  0x18   :  { %v368_v10 = vsub.s32 %v41_v4, %v43_v5  ;;  %v371_v16 = vsub.s32 %v58_v12, %v43_v5 }
  0x19   :  { %p306_p11 = por %p305_p10, %p304_p9 }
  0x1b   :  { %p307_p12 = pnand %p306_p11, %p300_p8 }
  0x85   :  { %v36_v8 = vpop.permute.xlu1 %35  ;;  %v30_v9 = vpop.permute.xlu0 %29 }
  0x86   :  { %v46_v11 = vcombine.low %v30_v9, %v36_v8 }
  0x88   :  { %v53_v15 = vrot.slane %v46_v11, %v368_v10 }
  0x89   :  { %v33_v13 = vpop.permute.xlu0 %32 }
  0x8a   :  { %v38_v14 = vcombine.low %v27_v0, %v33_v13 }
  0x8c   :  { %v45_v17 = vrot.slane %v38_v14, %v368_v10 }
  0x8e   :  { %v54_v18 = vcombine.low %v45_v17, %v53_v15  ;;  %v55_v19 = vcombine.high %v45_v17, %v53_v15 }
  0x90   :  { %v69_v20 = vrot.slane %v55_v19, %v371_v16  ;;  %v62_v21 = vrot.slane %v54_v18, %v371_v16 }
  0x92   :  { %v73_v22 = vsel %vm72_vm0, %v62_v21, 0.0  ;;  %v70_v24 = vcombine.high %v62_v21, %v331_v23  ;;  %v71_v25 = vcombine.high %v69_v20, %v331_v23  ;;  %v79_v28 = vsel %vm72_vm0, %v69_v20, 0.0 }
  0x93   :  { %74 = vadd.xlane.f32.xlu1 %v73_v22 }
  0x94   :  { %v76_v26 = vsel %vm72_vm0, %v70_v24, 0.0  ;;  %v82_v27 = vsel %vm72_vm0, %v71_v25, 0.0 }
  0x95   :  { %77 = vadd.xlane.f32.xlu0 %v76_v26 }
  0x97   :  { %83 = vadd.xlane.f32.xlu1 %v82_v27 }
  0x99   :  { %80 = vadd.xlane.f32.xlu0 %v79_v28 }
 0x120   :  { %v75_v29 = vpop.xlane.xlu1 %74 }
 0x121   :  { %v86_v30 = vmul.f32 0.03125, %v75_v29 }
 0x122   :  { %v78_v31 = vpop.xlane.xlu0 %77 }
 0x123   :  { %v382_v32 = vsub.f32 %v62_v21, %v86_v30  ;;  %v87_v33 = vmul.f32 0.03125, %v78_v31 }
 0x124   :  { %v84_v34 = vpop.xlane.xlu1 %83 }
 0x125   :  { %v384_v35 = vsub.f32 %v70_v24, %v87_v33  ;;  %v89_v36 = vmul.f32 0.03125, %v84_v34  ;;  %v94_v37 = vmul.f32 %v382_v32, %v382_v32 }
 0x126   :  { %v81_v38 = vpop.xlane.xlu0 %80 }
 0x127   :  { %v388_v39 = vsub.f32 %v71_v25, %v89_v36  ;;  %v88_v40 = vmul.f32 0.03125, %v81_v38  ;;  %v98_v41 = vsel %vm72_vm0, %v94_v37, 0.0  ;;  %v95_v42 = vmul.f32 %v384_v35, %v384_v35 }
 0x128   :  { %99 = vadd.xlane.f32.xlu0 %v98_v41 }
 0x129   :  { %v393_v43 = vsub.f32 %v69_v20, %v88_v40  ;;  %v101_v44 = vsel %vm72_vm0, %v95_v42, 0.0  ;;  %v97_v45 = vmul.f32 %v388_v39, %v388_v39 }
 0x12a   :  { %102 = vadd.xlane.f32.xlu1 %v101_v44 }
 0x12b   :  { %v96_v46 = vmul.f32 %v393_v43, %v393_v43  ;;  %v107_v47 = vsel %vm72_vm0, %v97_v45, 0.0 }
 0x12d   :  { %v104_v48 = vsel %vm72_vm0, %v96_v46, 0.0 }
 0x12e   :  { %108 = vadd.xlane.f32.xlu1 %v107_v47  ;;  %105 = vadd.xlane.f32.xlu0 %v104_v48 }
 0x1b5   :  { %v100_v49 = vpop.xlane.xlu0 %99 }
 0x1b6   :  { %v111_v50 = vmul.f32 0.032258064, %v100_v49 }
 0x1b7   :  { %v103_v51 = vpop.xlane.xlu1 %102 }
 0x1b8   :  { %261 = vrsqrt.f32 %v111_v50  ;;  %v112_v52 = vmul.f32 0.032258064, %v103_v51  ;;  %vm117_vm1 = vcmp.eq.f32.partialorder %v111_v50, inf  ;;  %v120_v59 = vand.u32 2147483648, %v111_v50 }
 0x1b9   :  { %vm119_vm2 = vcmp.eq.f32.partialorder %v111_v50, 0.0 }
 0x1ba   :  { %263 = vrsqrt.f32 %v112_v52  ;;  %vm124_vm3 = vcmp.eq.f32.partialorder %v112_v52, inf  ;;  %v127_v0 = vand.u32 2147483648, %v112_v52  ;;  %vm126_vm4 = vcmp.eq.f32.partialorder %v112_v52, 0.0 }
 0x1bb   :  { %v109_v53 = vpop.xlane.xlu1 %108  ;;  %v106_v54 = vpop.xlane.xlu0 %105 }
 0x1bc   :  { %v114_v55 = vmul.f32 0.032258064, %v109_v53  ;;  %v113_v56 = vmul.f32 0.032258064, %v106_v54 }
 0x1be   :  { %265 = vrsqrt.f32 %v114_v55  ;;  %vm138_vm5 = vcmp.eq.f32.partialorder %v114_v55, inf  ;;  %v141_v7 = vand.u32 2147483648, %v114_v55  ;;  %vm140_vm6 = vcmp.eq.f32.partialorder %v114_v55, 0.0 }
 0x1bf   :  { %267 = vrsqrt.f32 %v113_v56  ;;  %vm131_vm7 = vcmp.eq.f32.partialorder %v113_v56, inf  ;;  %v134_v12 = vand.u32 2147483648, %v113_v56  ;;  %vm133_vm8 = vcmp.eq.f32.partialorder %v113_v56, 0.0 }
 0x1c2   :  { %v262_v57 = vpop.eup %261 }
 0x1c3   :  { %v116_v58 = vmul.f32 %v262_v57, %v111_v50 }
 0x1c4   :  { %v264_v60 = vpop.eup %263 }
 0x1c5   :  { %v118_v61 = vsel %vm117_vm1, %v111_v50, %v116_v58  ;;  %v123_v62 = vmul.f32 %v264_v60, %v112_v52 }
 0x1c6   :  { %v121_v63 = vsel %vm119_vm2, %v120_v59, %v118_v61 }
 0x1c7   :  { %v143_v1 = vadd.f32 1e-06, %v121_v63  ;;  %v125_v3 = vsel %vm124_vm3, %v112_v52, %v123_v62 }
 0x1c8   :  { %v266_v2 = vpop.eup %265  ;;  %v128_v6 = vsel %vm126_vm4, %v127_v0, %v125_v3 }
 0x1c9   :  { %v268_v4 = vpop.eup %267  ;;  %v137_v5 = vmul.f32 %v266_v2, %v114_v55  ;;  %269 = vrcp.f32 %v143_v1  ;;  %v144_v9 = vadd.f32 1e-06, %v128_v6 }
 0x1ca   :  { %v130_v8 = vmul.f32 %v268_v4, %v113_v56 }
 0x1cb   :  { %v139_v11 = vsel %vm138_vm5, %v114_v55, %v137_v5  ;;  %271 = vrcp.f32 %v144_v9  ;;  %v252_v55 = vld [vmem:[%s435_s2] ss:$0 sm:$0xff] }
 0x1cc   :  { %v132_v13 = vsel %vm131_vm7, %v113_v56, %v130_v8  ;;  %v142_v14 = vsel %vm140_vm6, %v141_v7, %v139_v11 }
 0x1cd   :  { %v135_v15 = vsel %vm133_vm8, %v134_v12, %v132_v13  ;;  %v146_v17 = vadd.f32 1e-06, %v142_v14 }
 0x1ce   :  { %v145_v18 = vadd.f32 1e-06, %v135_v15 }
 0x1cf   :  { %273 = vrcp.f32 %v146_v17 }
 0x1d0   :  { %275 = vrcp.f32 %v145_v18 }
 0x1d3   :  { %v270_v19 = vpop.eup %269 }
 0x1d4   :  { %v151_v20 = vmul.f32 %v270_v19, %v143_v1 }
 0x1d5   :  { %v272_v21 = vpop.eup %271 }
 0x1d6   :  { %v152_v22 = vmul.f32 %v272_v21, %v144_v9  ;;  %v155_v25 = vsub.f32 2.0, %v151_v20 }
 0x1d8   :  { %v156_v26 = vsub.f32 2.0, %v152_v22  ;;  %v159_v34 = vmul.f32 %v270_v19, %v155_v25 }
 0x1d9   :  { %v274_v24 = vpop.eup %273 }
 0x1da   :  { %v276_v27 = vpop.eup %275  ;;  %v154_v28 = vmul.f32 %v274_v24, %v146_v17  ;;  %v160_v31 = vmul.f32 %v272_v21, %v156_v26  ;;  %v163_v41 = vmul.f32 %v159_v34, %v382_v32 }
 0x1db   :  { %v153_v29 = vmul.f32 %v276_v27, %v145_v18 }
 0x1dc   :  { %v158_v30 = vsub.f32 2.0, %v154_v28  ;;  %v164_v38 = vmul.f32 %v160_v31, %v384_v35 }
 0x1dd   :  { %v157_v33 = vsub.f32 2.0, %v153_v29 }
 0x1de   :  { %v162_v36 = vmul.f32 %v274_v24, %v158_v30 }
 0x1df   :  { %v161_v37 = vmul.f32 %v276_v27, %v157_v33 }
 0x1e0   :  { %v166_v40 = vmul.f32 %v162_v36, %v388_v39 }
 0x1e1   :  { %v165_v42 = vmul.f32 %v161_v37, %v393_v43 }
 0x1e2   :  { %v175_v44 = vcombine.low %v164_v38, %v166_v40 }
 0x1e3   :  { %v167_v45 = vcombine.low %v163_v41, %v165_v42 }
 0x1e4   :  { %v182_v46 = vrot.slane %v175_v44, %v368_v10 }
 0x1e5   :  { %v174_v47 = vrot.slane %v167_v45, %v368_v10 }
 0x1e7   :  { %v184_v48 = vcombine.high %v174_v47, %v182_v46  ;;  %v183_v49 = vcombine.low %v174_v47, %v182_v46 }
 0x1e9   :  { %v198_v50 = vrot.slane %v184_v48, %v371_v16  ;;  %v191_v51 = vrot.slane %v183_v49, %v371_v16  ;;  %v251_v16 = vld [vmem:[%s434_s1] ss:$0 sm:$0xff] }
 0x1eb   :  { %206 = vrot.lane.b32.xlu1 %v198_v50, %s328_s26  ;;  %v199_v35 = vcombine.high %v191_v51, %v331_v23  ;;  %v200_v32 = vcombine.high %v198_v50, %v331_v23 }
 0x1ed   :  { %202 = vrot.lane.b32.xlu0 %v199_v35, %s326_s24 }
 0x1ef   :  { %210 = vrot.lane.b32.xlu1 %v200_v32, %s327_s25 }
 0x25d   :  { %v207_v39 = vpop.permute.xlu1 %206 }
 0x25f   :  { %v203_v10 = vpop.permute.xlu0 %202 }
 0x260   :  { %v214_v43 = vsel %vm213_vm9, %v191_v51, %v203_v10 }
 0x261   :  { %v211_v52 = vpop.permute.xlu1 %210  ;;  %v216_v53 = vsel %vm215_vm10, %v214_v43, %v207_v39 }
 0x262   :  { %v218_v54 = vsel %vm217_vm11, %v216_v53, %v211_v52 }
 0x263   :  { %v227_v23 = vmul.f32 %v251_v16, %v218_v54 }
 0x265   :  { %v234_v56 = vadd.f32 %v252_v55, %v227_v23 }
 0x267   :  { %235 = vst [vmem:[#allocation5] sm:$0xf] %v234_v56 }
 0x268   :  { %310 = shalt.err (!%p307_p12)
}
 0x269   :  { %s311_s7 = scalar_lea.hbm %s436_s3, 64 }
 0x26a   :  { %p312_p13 = scmp.ne.s32.totalorder %s436_s3, %s311_s7  ;;  %p315_p0 = scmp.lt.u32.totalorder %s311_s7, %s436_s3 }
 0x26c   :  { %p317_p1 = pnand %p315_p0, %p312_p13 }
 0x26e   :  { %320 = shalt.err (!%p317_p1)
}
 0x26f   :  { %245 = dma.vmem_to_hbm [thread:$0]  %s243_s4, 64, %s436_s3, [#allocation4]  }
 0x270   :  { %323 = dma.done.wait [#allocation4], 64  }
 0x271   :  { %324 = vsyncadd [#allocation4], 4294967232 }
 0x272   :  { %249 = vsyncpa [#allocation3], 1 }
 0x273   :  { %250 = vsyncpa [#allocation4], 1 }

</bundles_post_ra>
